<compile_context>
chip_gen: v6e
topology: v6e:2x2x1
jax: 0.10.0
libtpu: 0.0.40
codegen_flags: <defaults>
</compile_context>

<pallas_src>
import functools

import jax
import jax.numpy as jnp
import numpy as np
from jax.experimental import pallas as pl
from jax.experimental.pallas import tpu as pltpu


_LANE = 128       # channel dims padded to multiples of the lane width
_NODE_PAD = 512   # node dim padded so 256/512 row tiles divide it exactly


def _round_up(x, m):
    return (x + m - 1) // m * m


@functools.lru_cache(maxsize=1)
def _vmem_limits():
    """(vmem_limit_bytes, tile-selection budget) for this TPU generation."""
    cap = 64 * 1024 * 1024  # conservative fallback (v7x per-TensorCore VMEM)
    try:
        info = pltpu.get_tpu_info()
        cap = int(getattr(info, "vmem_capacity_bytes", cap) or cap)
    except Exception:
        pass
    return int(cap * 0.85), int(cap * 0.70)


# ----------------------------- Pallas kernel --------------------------------

def _gcn_layer_kernel(adj_ref, xw_ref, scale_ref, b_ref, o_ref, acc_ref, *,
                      tk, relu, normalize):
    """acc += adj_tile @ xw[k-slice]; on last k: scale, bias, LeakyReLU, L2.

    adj_ref   : (TM, TK) int8       streamed row/col tile of the binary adjacency
    xw_ref    : (N_pad, C_out_pad)  resident x @ w (bf16), DMA'd once
    scale_ref : (TM, 1) f32         per-row 1/deg (folds the D^-1 normalization)
    b_ref     : (1, C_out_pad) f32  bias
    o_ref     : (TM, C_out_pad) f32
    acc_ref   : (TM, C_out_pad) f32 VMEM accumulator scratch
    """
    k = pl.program_id(1)

    @pl.when(k == 0)
    def _():
        acc_ref[...] = jnp.zeros_like(acc_ref)

    off = pl.multiple_of(k * tk, tk)
    xw = xw_ref[pl.ds(off, tk), :]
    # int8 {0,1,...} -> bf16 for the MXU; cast cost is proportional to the
    # streamed adj tile (necessary work), not to the resident operands.
    a = adj_ref[...].astype(xw.dtype)
    acc_ref[...] += jnp.dot(a, xw, preferred_element_type=jnp.float32)

    @pl.when(k == pl.num_programs(1) - 1)
    def _():
        out = acc_ref[...] * scale_ref[...] + b_ref[...]   # D^-1 row scale + bias
        if relu:                                           # LeakyReLU(0.2)
            out = jnp.where(out >= 0, out, 0.2 * out)
        if normalize:                                      # fused F.normalize(dim=1)
            sumsq = jnp.sum(out * out, axis=1, keepdims=True)
            out = out * jax.lax.rsqrt(jnp.maximum(sumsq, 1e-24))
        o_ref[...] = out.astype(o_ref.dtype)


def _pick_tiles(n_pad, c_out_pad, adj_bytes, stream_bytes, budget):
    """(TM, TK) using real element sizes against the generation's VMEM budget."""
    # Row tile: multiple of 256 to fill the 256-wide MXUs on v6e/v7x; keep
    # >= 2 row tiles so v7x's two TensorCores both get work on the parallel axis.
    tm = 512 if n_pad >= 1024 else min(256, n_pad)
    # Fixed working set.  Streamed operands are double-buffered by BlockSpec;
    # the resident xw also gets 2 buffers (pipeline_mode=pl.Buffered(1) could
    # reclaim half of that on v7x, left off here to keep lowering simple).
    fixed = (2 * n_pad * c_out_pad * stream_bytes   # resident x @ w
             + 2 * tm * c_out_pad * 4               # output tile
             + tm * c_out_pad * 4                   # f32 accumulator scratch
             + 2 * tm * 4                           # per-row 1/deg tile
             + 2 * c_out_pad * 4)                   # bias
    assert fixed <= budget, (
        f"resident x@w + accumulators ({fixed} B) exceed VMEM budget ({budget} B)")
    for tk in (8192, 4096, 2048, 1024, 512, 256, 128):
        if tk <= n_pad and n_pad % tk == 0:
            if fixed + 2 * tm * tk * adj_bytes <= budget:
                return tm, tk
    raise AssertionError("no adjacency column tile fits the VMEM budget")


# ----------------------------- JAX wrapper -----------------------------------

def graph_conv(adj_i8, row_scale, x_p, w_p, b_p, *, relu, normalize,
               stream_dtype=jnp.bfloat16):
    """One GraphConv layer: diag(row_scale) @ (A @ (x @ w)) + b (+LeakyReLU, +L2)."""
    n_pad = adj_i8.shape[0]
    c_out_pad = w_p.shape[1]
    # x @ w once, outside the grid loop, cast to the streaming dtype here so no
    # per-grid-step cast happens inside the kernel.
    xw = jnp.dot(x_p, w_p, preferred_element_type=jnp.float32).astype(stream_dtype)

    vmem_limit, budget = _vmem_limits()
    tm, tk = _pick_tiles(n_pad, c_out_pad,
                         int(np.dtype(adj_i8.dtype).itemsize),
                         int(np.dtype(xw.dtype).itemsize),
                         budget)

    kern = functools.partial(_gcn_layer_kernel, tk=tk, relu=relu,
                             normalize=normalize)
    return pl.pallas_call(
        kern,
        out_shape=jax.ShapeDtypeStruct((n_pad, c_out_pad), jnp.float32),
        grid_spec=pltpu.PrefetchScalarGridSpec(
            num_scalar_prefetch=0,
            grid=(n_pad // tm, n_pad // tk),
            in_specs=[
                pl.BlockSpec((tm, tk), lambda i, k: (i, k)),            # adj: streamed int8
                pl.BlockSpec((n_pad, c_out_pad), lambda i, k: (0, 0)),  # xw: resident
                pl.BlockSpec((tm, 1), lambda i, k: (i, 0)),             # 1/deg row scale
                pl.BlockSpec((1, c_out_pad), lambda i, k: (0, 0)),      # bias
            ],
            out_specs=pl.BlockSpec((tm, c_out_pad), lambda i, k: (i, 0)),
            scratch_shapes=[pltpu.VMEM((tm, c_out_pad), jnp.float32)],
        ),
        compiler_params=pltpu.CompilerParams(
            dimension_semantics=("parallel", "arbitrary"),
            vmem_limit_bytes=vmem_limit,
        ),
    )(adj_i8, xw, row_scale, b_p)


# ----------------------------- GCN module ------------------------------------

def _xavier_uniform(key, fan_in, fan_out):
    bound = np.sqrt(6.0 / (fan_in + fan_out))
    return jax.random.uniform(key, (fan_in, fan_out), jnp.float32, -bound, bound)


def _build_adj(n, edges, n_pad):
    """edge list -> (int8 count matrix A, f32 per-row 1/deg) with
    diag(scale) @ A == the reference row-normalized (D^-1 A) adjacency."""
    a = np.zeros((n_pad, n_pad), dtype=np.float32)
    e = np.asarray(edges, dtype=np.int64)
    np.add.at(a, (e[:, 0], e[:, 1]), 1.0)      # coo_matrix sums duplicates
    rowsum = a.sum(axis=1)
    r_inv = np.where(rowsum > 0, 1.0 / np.maximum(rowsum, 1e-12), 0.0)
    assert a.max() <= 127, "edge multiplicity too large for int8 adjacency"
    return a.astype(np.int8), r_inv.astype(np.float32).reshape(n_pad, 1)


class GCN:
    """JAX/Pallas re-implementation of the PyTorch GCN module (inference)."""

    def __init__(self, n, edges, in_channels, out_channels, hidden_layers, key):
        self.n = n
        self.in_channels = in_channels
        self.out_channels = out_channels
        self.n_pad = _round_up(max(n, 1), _NODE_PAD)

        adj_i8, r_inv = _build_adj(n, edges, self.n_pad)
        self.adj = jnp.asarray(adj_i8)              # int8 binary/count adjacency
        self.row_scale = jnp.asarray(r_inv)         # (n_pad, 1) f32 = 1/deg

        hl = hidden_layers.split(',')
        if hl[-1] == 'd':
            hl = hl[:-1]
        # TODO(synk): nn.Dropout(p=0.5) is stochastic in training mode; modeled
        # as identity (inference semantics).
        widths = []
        for c in hl:
            if c[0] == 'd':
                c = c[1:]
            widths.append(int(c))

        self.layers = []      # padded (w, b, relu) consumed by the Pallas kernel
        self.ref_layers = []  # unpadded weights for the pure-JAX reference
        last_c = in_channels
        for i, c in enumerate(widths + [out_channels]):
            relu = i < len(widths)
            key, sub = jax.random.split(key)
            w = _xavier_uniform(sub, last_c, c)
            b = jnp.zeros((c,), jnp.float32)
            ci_p = _round_up(last_c, _LANE)
            co_p = _round_up(c, _LANE)
            w_p = jnp.zeros((ci_p, co_p), jnp.float32).at[:last_c, :c].set(w)
            b_p = jnp.zeros((1, co_p), jnp.float32).at[0, :c].set(b)
            self.layers.append((w_p, b_p, relu))
            self.ref_layers.append((w, b, relu))
            last_c = c

    def __call__(self, x):
        c_in_pad = _round_up(self.in_channels, _LANE)
        x_p = jnp.zeros((self.n_pad, c_in_pad), jnp.float32)
        x_p = x_p.at[:self.n, :self.in_channels].set(x.astype(jnp.float32))
        n_layers = len(self.layers)
        for li, (w_p, b_p, relu) in enumerate(self.layers):
            x_p = graph_conv(self.adj, self.row_scale, x_p, w_p, b_p,
                             relu=relu, normalize=(li == n_layers - 1))
        return x_p[:self.n, :self.out_channels]

    def reference(self, x):
        """Pure-JAX f32 forward for validation."""
        adj = self.row_scale[:self.n] * self.adj[:self.n, :self.n].astype(jnp.float32)
        h = x.astype(jnp.float32)
        with jax.default_matmul_precision("float32"):
            for w, b, relu in self.ref_layers:
                h = adj @ (h @ w) + b
                if relu:
                    h = jnp.where(h >= 0, h, 0.2 * h)
        norm = jnp.sqrt(jnp.sum(h * h, axis=1, keepdims=True))
        return h / jnp.maximum(norm, 1e-12)


# ----------------------------- demo -------------------------------------------

if __name__ == "__main__":
    n = 32
    in_channels = 16
    out_channels = 8
    hidden_layers = "d32,32"

    # deterministic small graph: self loops + two ring offsets
    edges = ([(i, i) for i in range(n)]
             + [(i, (i + 1) % n) for i in range(n)]
             + [(i, (i + 3) % n) for i in range(n)])

    key = jax.random.PRNGKey(0)
    key, kx, kp = jax.random.split(key, 3)

    model = GCN(n, edges, in_channels, out_channels, hidden_layers, kp)
    x = jax.random.normal(kx, (n, in_channels), jnp.float32)

    out = model(x)
    jax.block_until_ready(out)
    assert out.shape == (n, out_channels)
    assert bool(jnp.all(jnp.isfinite(out)))

    ref = model.reference(x)
    err = float(jnp.max(jnp.abs(out - ref)))
    assert err < 5e-2, f"mismatch vs pure-JAX reference: {err}"

    print("KERNEL_OK")
</pallas_src>

<mosaic_0001>
module attributes {stable_mosaic.version = 11 : i64} {
  func.func @_gcn_layer_kernel(%arg0: i32, %arg1: i32, %arg2: memref<256x512xi8, #tpu.memory_space<vmem>>, %arg3: memref<512x128xbf16, #tpu.memory_space<vmem>>, %arg4: memref<256x1xf32, #tpu.memory_space<vmem>>, %arg5: memref<1x128xf32, #tpu.memory_space<vmem>>, %arg6: memref<256x128xf32, #tpu.memory_space<vmem>>, %arg7: memref<256x128xf32, #tpu.memory_space<vmem>>) attributes {dimension_semantics = [#tpu.dimension_semantics<parallel>, #tpu.dimension_semantics<arbitrary>], iteration_bounds = array<i64: 2, 1>, scalar_prefetch = 0 : i64, scratch_operands = 1 : i64, tpu.core_type = #tpu.core_type<tc>, window_params = [{transform_indices = @transform_0, window_bounds = array<i64: 256, 512>}, {pipeline_mode = #tpu.pipeline_mode<synchronous>, transform_indices = @transform_1, window_bounds = array<i64: 512, 128>}, {transform_indices = @transform_2, window_bounds = array<i64: 256, 1>}, {pipeline_mode = #tpu.pipeline_mode<synchronous>, transform_indices = @transform_3, window_bounds = array<i64: 1, 128>}, {transform_indices = @transform_4, window_bounds = array<i64: 256, 128>}]} {
    %c0_i32 = arith.constant 0 : i32
    %0 = arith.cmpi eq, %arg1, %c0_i32 : i32
    %1 = arith.extui %0 : i1 to i32
    %c0_i32_0 = arith.constant 0 : i32
    %2 = arith.cmpi ne, %1, %c0_i32_0 : i32
    scf.if %2 {
      %cst_9 = arith.constant 0.000000e+00 : f32
      %16 = vector.broadcast %cst_9 : f32 to vector<256x128xf32>
      %c0_10 = arith.constant 0 : index
      %c0_11 = arith.constant 0 : index
      %17 = vector.load %arg7[%c0_10, %c0_11] : memref<256x128xf32, #tpu.memory_space<vmem>>, vector<256x128xf32>
      tpu.vector_store %arg7[%c0_10, %c0_11], %16 {strides = array<i32>} : memref<256x128xf32, #tpu.memory_space<vmem>>, vector<256x128xf32>,
    } else {
    }
    %c512_i32 = arith.constant 512 : i32
    %3 = arith.muli %arg1, %c512_i32 : i32
    %4 = tpu.assume_multiple %3, 512 : i32
    %5 = arith.index_cast %4 : i32 to index
    %c0 = arith.constant 0 : index
    %6 = vector.load %arg3[%5, %c0] : memref<512x128xbf16, #tpu.memory_space<vmem>>, vector<512x128xbf16>
    %c0_1 = arith.constant 0 : index
    %c0_2 = arith.constant 0 : index
    %7 = vector.load %arg2[%c0_1, %c0_2] : memref<256x512xi8, #tpu.memory_space<vmem>>, vector<256x512xi8>
    %8 = arith.sitofp %7 : vector<256x512xi8> to vector<256x512xbf16>
    %c0_3 = arith.constant 0 : index
    %c0_4 = arith.constant 0 : index
    %9 = vector.load %arg7[%c0_3, %c0_4] : memref<256x128xf32, #tpu.memory_space<vmem>>, vector<256x128xf32>
    %cst = arith.constant dense<0.000000e+00> : vector<256x128xf32>
    %10 = tpu.matmul %8, %6, %cst {dimension_numbers = #tpu.dot_dimension_numbers<[1], [0], [0], [1], [0, 0, 1, 1], [], []>} : vector<256x512xbf16>, vector<512x128xbf16>, vector<256x128xf32> -> vector<256x128xf32>
    %11 = arith.addf %9, %10 : vector<256x128xf32>
    %c0_5 = arith.constant 0 : index
    %c0_6 = arith.constant 0 : index
    %12 = vector.load %arg7[%c0_5, %c0_6] : memref<256x128xf32, #tpu.memory_space<vmem>>, vector<256x128xf32>
    tpu.vector_store %arg7[%c0_5, %c0_6], %11 {strides = array<i32>} : memref<256x128xf32, #tpu.memory_space<vmem>>, vector<256x128xf32>,
    %c0_i32_7 = arith.constant 0 : i32
    %13 = arith.cmpi eq, %arg1, %c0_i32_7 : i32
    %14 = arith.extui %13 : i1 to i32
    %c0_i32_8 = arith.constant 0 : i32
    %15 = arith.cmpi ne, %14, %c0_i32_8 : i32
    scf.if %15 {
      %c0_9 = arith.constant 0 : index
      %c0_10 = arith.constant 0 : index
      %16 = vector.load %arg7[%c0_9, %c0_10] : memref<256x128xf32, #tpu.memory_space<vmem>>, vector<256x128xf32>
      %c0_11 = arith.constant 0 : index
      %c0_12 = arith.constant 0 : index
      %17 = vector.load %arg4[%c0_11, %c0_12] : memref<256x1xf32, #tpu.memory_space<vmem>>, vector<256x1xf32>
      %18 = vector.broadcast %17 : vector<256x1xf32> to vector<256x128xf32>
      %19 = arith.mulf %16, %18 : vector<256x128xf32>
      %c0_13 = arith.constant 0 : index
      %c0_14 = arith.constant 0 : index
      %20 = vector.load %arg5[%c0_13, %c0_14] : memref<1x128xf32, #tpu.memory_space<vmem>>, vector<1x128xf32>
      %21 = vector.broadcast %20 : vector<1x128xf32> to vector<256x128xf32>
      %22 = arith.addf %19, %21 : vector<256x128xf32>
      %cst_15 = arith.constant 0.000000e+00 : f32
      %23 = vector.broadcast %cst_15 : f32 to vector<256x128xf32>
      %24 = arith.cmpf oge, %22, %23 : vector<256x128xf32>
      %cst_16 = arith.constant 2.000000e-01 : f32
      %25 = vector.broadcast %cst_16 : f32 to vector<256x128xf32>
      %26 = arith.mulf %25, %22 : vector<256x128xf32>
      %27 = arith.select %24, %22, %26 : vector<256x128xi1>, vector<256x128xf32>
      %c0_17 = arith.constant 0 : index
      %c0_18 = arith.constant 0 : index
      %28 = vector.load %arg6[%c0_17, %c0_18] : memref<256x128xf32, #tpu.memory_space<vmem>>, vector<256x128xf32>
      tpu.vector_store %arg6[%c0_17, %c0_18], %27 {strides = array<i32>} : memref<256x128xf32, #tpu.memory_space<vmem>>, vector<256x128xf32>,
    } else {
    }
    return
  }
  func.func @transform_0(%arg0: i32, %arg1: i32) -> (i32, i32) {
    %c0_i32 = arith.constant 0 : i32
    return %arg0, %arg1 : i32, i32
  }
  func.func @transform_1(%arg0: i32, %arg1: i32) -> (i32, i32) {
    %c0_i32 = arith.constant 0 : i32
    %c0_i32_0 = arith.constant 0 : i32
    %c0_i32_1 = arith.constant 0 : i32
    return %c0_i32, %c0_i32_0 : i32, i32
  }
  func.func @transform_2(%arg0: i32, %arg1: i32) -> (i32, i32) {
    %c0_i32 = arith.constant 0 : i32
    %c0_i32_0 = arith.constant 0 : i32
    return %arg0, %c0_i32 : i32, i32
  }
  func.func @transform_3(%arg0: i32, %arg1: i32) -> (i32, i32) {
    %c0_i32 = arith.constant 0 : i32
    %c0_i32_0 = arith.constant 0 : i32
    %c0_i32_1 = arith.constant 0 : i32
    return %c0_i32, %c0_i32_0 : i32, i32
  }
  func.func @transform_4(%arg0: i32, %arg1: i32) -> (i32, i32) {
    %c0_i32 = arith.constant 0 : i32
    %c0_i32_0 = arith.constant 0 : i32
    return %arg0, %c0_i32 : i32, i32
  }
}

</mosaic_0001>

<bundles_post_ra>
// kernel: tpu_custom_call.1
= control target key start
LH: loop header
LB: loop body
LE: loop exit
PB: predicated region body
PF: predicated region fallthrough
CT: control target
= control target key end

     0   :  { %9 = vsyncpa [#allocation4], 0  ;;  %s2425_s0 = inlined_call_operand.vmem [shape: s8[512,512], index: 0, kind: input, shape index: {}]   ;;  %s2426_s1 = inlined_call_operand.hbm [shape: bf16[512,128], index: 1, kind: input, shape index: {}]   ;;  %s2427_s2 = inlined_call_operand.vmem [shape: f32[512,1], index: 2, kind: input, shape index: {}]   ;;  %s2428_s3 = inlined_call_operand.vmem [shape: f32[1,128], index: 3, kind: input, shape index: {}]   ;;  %s2429_s4 = inlined_call_operand.hbm [shape: f32[512,128], index: 4, kind: output, shape index: {}]  }
   0x1   :  { %10 = vsyncpa [#allocation5], 0 }
   0x2   :  { %12 = vsyncpa [#allocation5 + $0x1], 0  ;;  %s2143_s15 = smov 0   ;;  %s2145_s16 = smov 0  }
   0x3   :  { %s2147_s17 = smov 0   ;;  %s2149_s18 = smov 0  }
   0x4   :  { %s2151_s19 = smov 0   ;;  %s2153_s20 = smov 0  }
   0x5 LB: > { %s1621_s21 = sadd.s32 4294967295, %s2109_s20   ;;  %s1622_s22 = sadd.s32 4294967294, %s2109_s20   ;;  %s2109_s20 = sphi %s2153_s20, %s18_s20   ;;  %s2105_s19 = sphi %s2151_s19, %s2438_s19   ;;  %s2101_s18 = sphi %s2149_s18, %s2437_s18   ;;  %s2097_s17 = sphi %s2147_s17, %s2436_s17   ;;  %s2093_s16 = sphi %s2145_s16, %s2435_s16   ;;  %s2089_s15 = sphi %s2143_s15, %s2434_s15  }
   0x6   : > { %s30_s23 = sadd.s32 1, %s2105_s19  ;;  %s133_s24 = sadd.s32 1, %s2097_s17 }
   0x7   : > { %p32_p0 = scmp.ge.s32.totalorder %s30_s23, 2  ;;  %p143_p1 = scmp.ne.s32.totalorder %s2097_s17, %s2093_s16 }
   0x8   : > { %p144_p2 = scmp.eq.s32.totalorder %s1621_s21, 1  ;;  %p149_p3 = scmp.ne.s32.totalorder %s2093_s16, %s2089_s15 }
   0x9   : > { %s2440_s23 = smov (%p32_p0, %s30_s23), 0  ;;  %p150_p5 = scmp.eq.s32.totalorder %s1622_s22, 1 }
   0xa   : > { %p2183_p4 = por %p144_p2, %p143_p1  ;;  %s130_s26 = ssub.s32 %s2105_s19, %s2440_s23 }
   0xb   : > { %p1623_p6 = scmp.ge.s32.totalorder %s2109_s20, 1  ;;  %p131_p7 = scmp.eq.s32.totalorder %s130_s26, 0 }
   0xc   : > { %p2190_p8 = por %p150_p5, %p149_p3  ;;  %p157_p9 = scmp.lt.s32.totalorder %s2109_s20, 3 }
   0xd   : > { %s2196_s28 = scalar_select %p131_p7, %s2097_s17, %s133_s24  }
   0xe   : > { %p2198_p10 = pnand %p1623_p6, %p157_p9  ;;  %p2202_p11 = scmp.eq.s32.totalorder %s1621_s21, 0 }
   0xf   : > { %s2111_s5 = smov [#allocation3]  }
  0x10   : > { %p1904_p12 = pneg %p2198_p10  ;;  %s169_s6 = sshll.u32 %s2111_s5, 4  ;;  %s170_s6 = int_to_ptr.vmem [resolvable:$true] %s169_s6 }
  0x11   : > { %s2014_s7 = scalar_lea.vmem %s170_s6, 4096  ;;  %p2022_p5 = scmp.lt.s32.totalorder %s170_s6, %s170_s6 }
  0x12   : > { %p1905_p13 = pnand %p2202_p11, %p1904_p12  ;;  %p2015_p1 = scmp.ne.s32.totalorder %s170_s6, %s2014_s7 }
  0x13   : > { %p2023_p6 = scmp.lt.s32.totalorder %s2014_s7, %s2014_s7 }
  0x14   : > { %p2005_p0 = pneg %p1905_p13 }
  0x15   : > { %p2024_p7 = por %p2023_p6, %p2022_p5 }
  0x16   : > { %p2017_p2 = pnand %p2015_p1, %p2005_p0 }
  0x18   : > { %p2018_p3 = pneg %p2017_p2 }
  0x1a   : > { %p2025_p9 = pnand %p2024_p7, %p2018_p3 }
  0x1c   : > { %2028 = shalt.err (!%p2025_p9)
}
  0x1d   : > { %s2112_s8 = smov 64   ;;  %s2113_s9 = smov 4  }
  0x1e   : > { %1907 = dma.hbm_to_vmem [thread:$0]  (!%p1905_p13), %s2426_s1, 4096, %s170_s6, [#allocation4], %s2112_s8, %s2112_s8, %s2113_s9  }
  0x1f   : > { %212 = sbr.rel (%p2198_p10) target bundleno = 416 (0x1a0), region = 36 }
  0x24   : > { %2080 = dma.done.wait (%p2202_p11), [#allocation4], 4096  }
  0x25   : > { %2082 = vsyncadd (%p2202_p11), [#allocation4], 4294963200  ;;  %v2114_v0 = vmov 0   ;;  %v1971_v1 = vld [vmem:[#allocation3 + $0x78] sm:$0xff]   ;;  %v1975_v5 = vld [vmem:[#allocation3 + $0x70] sm:$0xff]   ;;  %s1629_s12 = sshll.u32 %s2101_s18, 3 }
  0x26   : > { %1969 = vset.pattern.permute.xlu0 %v2114_v0  ;;  %1970 = vset.pattern.permute.xlu1 %v2114_v0  ;;  %v1972_v2 = vld [vmem:[#allocation3 + $0xf8] sm:$0xff]   ;;  %v1976_v6 = vld [vmem:[#allocation3 + $0xf0] sm:$0xff]   ;;  %v1979_v9 = vld [vmem:[#allocation3 + $0x68] sm:$0xff]   ;;  %p250_p10 = scmp.lt.s32.totalorder %s1629_s12, 15  ;;  %s1632_s13 = sshll.u32 %s2101_s18, 5 }
  0x27   : > { %1674 = vmatprep.subr.bf16.mxu0 %v1971_v1  ;;  %v1973_v3 = vld [vmem:[#allocation3 + $0x38] sm:$0xff]   ;;  %1786 = vmatprep.subr.bf16.mxu1 %v1972_v2  ;;  %v1977_v7 = vld [vmem:[#allocation3 + $0x30] sm:$0xff]   ;;  %v1980_v10 = vld [vmem:[#allocation3 + $0xe8] sm:$0xff]   ;;  %p261_p11 = scmp.lt.s32.totalorder %s1632_s13, 63  ;;  %s245_s6 = sand.u32 1, %s2093_s16  }
  0x28   : > { %v1974_v4 = vld [vmem:[#allocation3 + $0xb8] sm:$0xff]   ;;  %1675 = vmatpush3.bf16.msra.mxu0 %v1973_v3  ;;  %v1978_v8 = vld [vmem:[#allocation3 + $0xb0] sm:$0xff]   ;;  %v1981_v11 = vld [vmem:[#allocation3 + $0x28] sm:$0xff]   ;;  %s2442_s12 = smov (!%p250_p10, %s1629_s12), 15  ;;  %s1628_s9 = sshll.u32 %s245_s6, 8 }
  0x29   : > { %1787 = vmatpush3.bf16.msra.mxu1 %v1974_v4  ;;  %1676 = vmatprep.subr.bf16.mxu0 %v1975_v5  ;;  %v1982_v12 = vld [vmem:[#allocation3 + $0xa8] sm:$0xff]   ;;  %v1983_v13 = vld [vmem:[#allocation3 + $0x60] sm:$0xff]   ;;  %v1987_v17 = vld [vmem:[#allocation3 + $0x58] sm:$0xff]   ;;  %s1672_s14 = sshll.u32 %s2442_s12, 5  ;;  %s2444_s13 = smov (!%p261_p11, %s1632_s13), 63 }
  0x2a   : > { %1788 = vmatprep.subr.bf16.mxu1 %v1976_v6  ;;  %v1984_v14 = vld [vmem:[#allocation3 + $0xe0] sm:$0xff]   ;;  %v1988_v18 = vld [vmem:[#allocation3 + $0xd8] sm:$0xff]   ;;  %v1991_v21 = vld [vmem:[#allocation3 + $0x50] sm:$0xff]   ;;  %s2224_s24 = scalar_lea.vmem %s2425_s0, %s1672_s14  ;;  %s1633_s26 = sshll.u32 %s2444_s13, 3 }
  0x2b   : > { %v1985_v15 = vld [vmem:[#allocation3 + $0x20] sm:$0xff]   ;;  %v1989_v19 = vld [vmem:[#allocation3 + $0x18] sm:$0xff]   ;;  %v1992_v22 = vld [vmem:[#allocation3 + $0xd0] sm:$0xff]   ;;  %s2233_s5 = scalar_lea.vmem %s2427_s2, %s1633_s26  ;;  %s2305_s10 = scalar_lea.vmem [#allocation6], %s1628_s9 }
  0x2c   : > { %1677 = vmatpush3.bf16.msra.mxu0 %v1977_v7  ;;  %v1986_v16 = vld [vmem:[#allocation3 + $0xa0] sm:$0xff]   ;;  %v1990_v20 = vld [vmem:[#allocation3 + $0x98] sm:$0xff]   ;;  %v1993_v23 = vld [vmem:[#allocation3 + $0x10] sm:$0xff]   ;;  %s1673_s11 = sshll.u32 %s2101_s18, 12  ;;  %s1519_s12 = sshll.u32 %s2305_s10, 4  ;;  %s2375_s12 = int_to_ptr.vmem [resolvable:$true] %s1519_s12 }
  0x2d   : > { %1789 = vmatpush3.bf16.msra.mxu1 %v1978_v8  ;;  %1678 = vmatprep.subr.bf16.mxu0 %v1979_v9  ;;  %v1994_v24 = vld [vmem:[#allocation3 + $0x90] sm:$0xff]   ;;  %v1995_v25 = vld [vmem:[#allocation3 + $0x48] sm:$0xff]   ;;  %v1999_v29 = vld [vmem:[#allocation3 + $0x40] sm:$0xff]   ;;  %s2373_s21 = scalar_lea.hbm %s2429_s4, %s1673_s11  ;;  %s2380_s18 = scalar_lea.sflag [#allocation5], %s245_s6 }
  0x2e   : > { %1790 = vmatprep.subr.bf16.mxu1 %v1980_v10  ;;  %v1996_v26 = vld [vmem:[#allocation3 + $0xc8] sm:$0xff]   ;;  %v2000_v30 = vld [vmem:[#allocation3 + $0xc0] sm:$0xff]   ;;  %v376_v34 = vld [vmem:[%s2224_s24 + $0x18] sm:$0xff]  ;;  %s2029_s22 = scalar_lea.vmem %s2375_s12, 4096 }
  0x2f   : > { %v1997_v27 = vld [vmem:[#allocation3 + $0x8] sm:$0xff]   ;;  %v2001_v31 = vld [vmem:[#allocation3] sm:$0xff]   ;;  %v408_v38 = vunpack.c.l.s8.bf16 %v376_v34  ;;  %v412_v39 = vunpack.c.h.s8.bf16 %v376_v34  ;;  %v375_v40 = vld [vmem:[%s2224_s24 + $0x10] sm:$0xff]  ;;  %p2030_p12 = scmp.ne.s32.totalorder %s2375_s12, %s2029_s22 }
  0x30   : > { %1679 = vmatpush3.bf16.msra.mxu0 %v1981_v11  ;;  %v1998_v28 = vld [vmem:[#allocation3 + $0x88] sm:$0xff]   ;;  %v2002_v32 = vld [vmem:[#allocation3 + $0x80] sm:$0xff]   ;;  %v407_v42 = vunpack.c.l.s8.bf16 %v375_v40  ;;  %v380_v44 = vld [vmem:[%s2224_s24 + $0x38] sm:$0xff]  ;;  %v411_v48 = vunpack.c.h.s8.bf16 %v375_v40 }
  0x31   : > { %1791 = vmatpush3.bf16.msra.mxu1 %v1982_v12  ;;  %1680 = vmatprep.subr.bf16.mxu0 %v1983_v13  ;;  %v374_v33 = vld [vmem:[%s2224_s24 + $0x8] sm:$0xff]  ;;  %v373_v35 = vld [vmem:[%s2224_s24] sm:$0xff]  ;;  %v1116_v46 = vld [vmem:[%s2233_s5 + $0x10] sm:$0xff]  ;;  %v416_v51 = vunpack.c.l.s8.bf16 %v380_v44  ;;  %v420_v61 = vunpack.c.h.s8.bf16 %v380_v44  ;;  %p2031_p13 = pnand %p2030_p12, %p2183_p4 }
  0x32   : > { %1792 = vmatprep.subr.bf16.mxu1 %v1984_v14  ;;  %v406_v36 = vunpack.c.l.s8.bf16 %v374_v33  ;;  %v410_v37 = vunpack.c.h.s8.bf16 %v374_v33  ;;  %v405_v41 = vunpack.c.l.s8.bf16 %v373_v35  ;;  %886 = vmatprep.mubr.bf16.mxu1 %v408_v38  ;;  %v378_v43 = vld [vmem:[%s2224_s24 + $0x28] sm:$0xff]  ;;  %v1114_v45 = vld [vmem:[%s2233_s5] sm:$0xff]  ;;  %v409_v47 = vunpack.c.h.s8.bf16 %v373_v35  ;;  %v1117_v52 = vld [vmem:[%s2233_s5 + $0x18] sm:$0xff] }
  0x33   : > { %1148 = vperm.xlu0 %1969, %v1114_v45   ;;  %1158 = vperm.xlu1 %1970, %v1116_v46   ;;  %v1115_v49 = vld [vmem:[%s2233_s5 + $0x8] sm:$0xff]  ;;  %v414_v50 = vunpack.c.l.s8.bf16 %v378_v43  ;;  %v1118_v53 = vld [vmem:[%s2233_s5 + $0x20] sm:$0xff]  ;;  %v379_v55 = vld [vmem:[%s2224_s24 + $0x30] sm:$0xff]  ;;  %v418_v60 = vunpack.c.h.s8.bf16 %v378_v43  ;;  %p2032_p0 = pneg %p2031_p13 }
  0x34   : > { %1681 = vmatpush3.bf16.msra.mxu0 %v1985_v15  ;;  %725 = vmatprep.mubr.bf16.mxu0 %v406_v36  ;;  %v377_v54 = vld [vmem:[%s2224_s24 + $0x20] sm:$0xff]  ;;  %v1119_v56 = vld [vmem:[%s2233_s5 + $0x28] sm:$0xff]  ;;  %v415_v58 = vunpack.c.l.s8.bf16 %v379_v55  ;;  %v1120_v59 = vld [vmem:[%s2233_s5 + $0x30] sm:$0xff]  ;;  %v419_v4 = vunpack.c.h.s8.bf16 %v379_v55 }
  0x35   : > { %1793 = vmatpush3.bf16.msra.mxu1 %v1986_v16  ;;  %1682 = vmatprep.subr.bf16.mxu0 %v1987_v17  ;;  %v413_v57 = vunpack.c.l.s8.bf16 %v377_v54  ;;  %v1121_v62 = vld [vmem:[%s2233_s5 + $0x38] sm:$0xff]  ;;  %v1122_v63 = vld [vmem:[%s2233_s5 + $0x40] sm:$0xff]  ;;  %v382_v0 = vld [vmem:[%s2224_s24 + $0x48] sm:$0xff]  ;;  %v417_v3 = vunpack.c.h.s8.bf16 %v377_v54 }
  0x36   : > { %1794 = vmatprep.subr.bf16.mxu1 %v1988_v18  ;;  %v384_v1 = vld [vmem:[%s2224_s24 + $0x58] sm:$0xff]  ;;  %v1123_v2 = vld [vmem:[%s2233_s5 + $0x48] sm:$0xff]  ;;  %v1124_v5 = vld [vmem:[%s2233_s5 + $0x50] sm:$0xff]  ;;  %v422_v6 = vunpack.c.l.s8.bf16 %v382_v0  ;;  %v426_v16 = vunpack.c.h.s8.bf16 %v382_v0 }
  0x37   : > { %1153 = vperm.xlu0 %1969, %v1115_v49   ;;  %1163 = vperm.xlu1 %1970, %v1117_v52   ;;  %v424_v7 = vunpack.c.l.s8.bf16 %v384_v1  ;;  %v1125_v8 = vld [vmem:[%s2233_s5 + $0x58] sm:$0xff]  ;;  %v1126_v9 = vld [vmem:[%s2233_s5 + $0x60] sm:$0xff]  ;;  %v383_v11 = vld [vmem:[%s2224_s24 + $0x50] sm:$0xff]  ;;  %v428_v17 = vunpack.c.h.s8.bf16 %v384_v1 }
  0x38   : > { %1683 = vmatpush3.bf16.msra.mxu0 %v1989_v19  ;;  %v381_v10 = vld [vmem:[%s2224_s24 + $0x40] sm:$0xff]  ;;  %v1127_v12 = vld [vmem:[%s2233_s5 + $0x68] sm:$0xff]  ;;  %v423_v14 = vunpack.c.l.s8.bf16 %v383_v11  ;;  %v1128_v15 = vld [vmem:[%s2233_s5 + $0x70] sm:$0xff] }
  0x39   : > { %1795 = vmatpush3.bf16.msra.mxu1 %v1990_v20  ;;  %1684 = vmatprep.subr.bf16.mxu0 %v1991_v21  ;;  %v421_v13 = vunpack.c.l.s8.bf16 %v381_v10  ;;  %v1129_v18 = vld [vmem:[%s2233_s5 + $0x78] sm:$0xff]  ;;  %v1130_v19 = vld [vmem:[%s2233_s5 + $0x80] sm:$0xff]  ;;  %v386_v20 = vld [vmem:[%s2224_s24 + $0x68] sm:$0xff] }
  0x3a   : > { %1796 = vmatprep.subr.bf16.mxu1 %v1992_v22  ;;  %v388_v21 = vld [vmem:[%s2224_s24 + $0x78] sm:$0xff]  ;;  %v1131_v22 = vld [vmem:[%s2233_s5 + $0x88] sm:$0xff]  ;;  %v1136_v35 = vld [vmem:[%s2233_s5 + $0xb0] sm:$0xff]  ;;  %v434_v36 = vunpack.c.h.s8.bf16 %v386_v20 }
  0x3b   : > { %1168 = vperm.xlu0 %1969, %v1118_v53   ;;  %1173 = vperm.xlu1 %1970, %v1119_v56   ;;  %v1137_v38 = vld [vmem:[%s2233_s5 + $0xb8] sm:$0xff]  ;;  %v390_v40 = vld [vmem:[%s2224_s24 + $0x88] sm:$0xff]  ;;  %v1140_v45 = vld [vmem:[%s2233_s5 + $0xd0] sm:$0xff] }
  0x3c   : > { %1685 = vmatpush3.bf16.msra.mxu0 %v1993_v23  ;;  %v425_v23 = vunpack.c.h.s8.bf16 %v381_v10  ;;  %v438_v46 = vunpack.c.l.s8.bf16 %v390_v40  ;;  %v1142_v49 = vld [vmem:[%s2233_s5 + $0xe0] sm:$0xff]  ;;  %v1143_v52 = vld [vmem:[%s2233_s5 + $0xe8] sm:$0xff]  ;;  %v1144_v55 = vld [vmem:[%s2233_s5 + $0xf0] sm:$0xff]  ;;  %v442_v56 = vunpack.c.h.s8.bf16 %v390_v40 }
  0x3d   : > { %1797 = vmatpush3.bf16.msra.mxu1 %v1994_v24  ;;  %1686 = vmatprep.subr.bf16.mxu0 %v1995_v25  ;;  %v427_v24 = vunpack.c.h.s8.bf16 %v383_v11  ;;  %v1132_v25 = vld [vmem:[%s2233_s5 + $0x90] sm:$0xff]  ;;  %v393_v1 = vld [vmem:[%s2224_s24 + $0xa0] sm:$0xff] }
  0x3e   : > { %1798 = vmatprep.subr.bf16.mxu1 %v1996_v26  ;;  %v430_v26 = vunpack.c.l.s8.bf16 %v386_v20  ;;  %v404_v20 = vld [vmem:[%s2224_s24 + $0xf8] sm:$0xff] }
  0x3f   : > { %1178 = vperm.xlu0 %1969, %v1120_v59   ;;  %1183 = vperm.xlu1 %1970, %v1121_v62   ;;  %v394_v59 = vld [vmem:[%s2224_s24 + $0xa8] sm:$0xff] }
  0x40   : > { %1687 = vmatpush3.bf16.msra.mxu0 %v1997_v27  ;;  %v432_v27 = vunpack.c.l.s8.bf16 %v388_v21 }
  0x41   : > { %1799 = vmatpush3.bf16.msra.mxu1 %v1998_v28  ;;  %1688 = vmatprep.subr.bf16.mxu0 %v1999_v29  ;;  %v1133_v28 = vld [vmem:[%s2233_s5 + $0x98] sm:$0xff]  ;;  %v1134_v29 = vld [vmem:[%s2233_s5 + $0xa0] sm:$0xff] }
  0x42   : > { %1800 = vmatprep.subr.bf16.mxu1 %v2000_v30  ;;  %v385_v30 = vld [vmem:[%s2224_s24 + $0x60] sm:$0xff] }
  0x43   : > { %1188 = vperm.xlu0 %1969, %v1122_v63   ;;  %1193 = vperm.xlu1 %1970, %v1123_v2   ;;  %v429_v33 = vunpack.c.l.s8.bf16 %v385_v30  ;;  %v433_v43 = vunpack.c.h.s8.bf16 %v385_v30  ;;  %v446_v63 = vunpack.c.l.s8.bf16 %v394_v59  ;;  %v395_v2 = vld [vmem:[%s2224_s24 + $0xb0] sm:$0xff]  ;;  %v468_v30 = vunpack.c.h.s8.bf16 %v404_v20 }
  0x44   : > { %1689 = vmatpush3.bf16.msra.mxu0 %v2001_v31  ;;  %v387_v31 = vld [vmem:[%s2224_s24 + $0x70] sm:$0xff]  ;;  %v451_v10 = vunpack.c.h.s8.bf16 %v395_v2 }
  0x45   : > { %1801 = vmatpush3.bf16.msra.mxu1 %v2002_v32  ;;  %v1135_v32 = vld [vmem:[%s2233_s5 + $0xa8] sm:$0xff]  ;;  %v431_v34 = vunpack.c.l.s8.bf16 %v387_v31  ;;  %v435_v44 = vunpack.c.h.s8.bf16 %v387_v31 }
  0x47   : > { %726 = vmatmul.mubr.bf16.vlgmr.msra.gmra.mxu0 %v405_v41  ;;  %1198 = vperm.xlu0 %1969, %v1124_v5   ;;  %v392_v41 = vld [vmem:[%s2224_s24 + $0x98] sm:$0xff]  ;;  %v450_v5 = vunpack.c.h.s8.bf16 %v394_v59 }
  0x48   : > { %887 = vmatmul.mubr.bf16.vlgmr.msra.gmra.mxu1 %v407_v42  ;;  %733 = vmatprep.mubr.bf16.mxu0 %v410_v37  ;;  %v436_v37 = vunpack.c.h.s8.bf16 %v388_v21  ;;  %v1139_v42 = vld [vmem:[%s2233_s5 + $0xc8] sm:$0xff] }
  0x49   : > { %894 = vmatprep.mubr.bf16.mxu1 %v412_v39  ;;  %1203 = vperm.xlu1 %1970, %v1125_v8   ;;  %v1138_v39 = vld [vmem:[%s2233_s5 + $0xc0] sm:$0xff]  ;;  %v400_v8 = vld [vmem:[%s2224_s24 + $0xd8] sm:$0xff] }
  0x4b   : > { %1208 = vperm.xlu0 %1969, %v1126_v9   ;;  %v449_v9 = vunpack.c.h.s8.bf16 %v393_v1 }
  0x4d   : > { %1213 = vperm.xlu1 %1970, %v1127_v12   ;;  %v456_v12 = vunpack.c.l.s8.bf16 %v400_v8 }
  0x4f   : > { %734 = vmatmul.mubr.bf16.gmra.mxu0 %v409_v47  ;;  %1218 = vperm.xlu0 %1969, %v1128_v15   ;;  %v440_v47 = vunpack.c.l.s8.bf16 %v392_v41 }
  0x50   : > { %895 = vmatmul.mubr.bf16.gmra.mxu1 %v411_v48  ;;  %741 = vmatprep.mubr.bf16.mxu0 %v414_v50  ;;  %v1141_v48 = vld [vmem:[%s2233_s5 + $0xd8] sm:$0xff]  ;;  %v389_v50 = vld [vmem:[%s2224_s24 + $0x80] sm:$0xff] }
  0x51   : > { %902 = vmatprep.mubr.bf16.mxu1 %v416_v51  ;;  %1223 = vperm.xlu1 %1970, %v1129_v18   ;;  %v391_v51 = vld [vmem:[%s2224_s24 + $0x90] sm:$0xff]  ;;  %v437_v53 = vunpack.c.l.s8.bf16 %v389_v50  ;;  %v460_v18 = vunpack.c.h.s8.bf16 %v400_v8 }
  0x52   : > { %v439_v54 = vunpack.c.l.s8.bf16 %v391_v51  ;;  %v443_v62 = vunpack.c.h.s8.bf16 %v391_v51 }
  0x53   : > { %1228 = vperm.xlu0 %1969, %v1130_v19   ;;  %v402_v19 = vld [vmem:[%s2224_s24 + $0xe8] sm:$0xff] }
  0x55   : > { %1233 = vperm.xlu1 %1970, %v1131_v22  }
  0x57   : > { %742 = vmatmul.mubr.bf16.gmra.mxu0 %v413_v57  ;;  %1238 = vperm.xlu0 %1969, %v1132_v25   ;;  %v444_v57 = vunpack.c.h.s8.bf16 %v392_v41  ;;  %v401_v25 = vld [vmem:[%s2224_s24 + $0xe0] sm:$0xff] }
  0x58   : > { %903 = vmatmul.mubr.bf16.gmra.mxu1 %v415_v58  ;;  %749 = vmatprep.mubr.bf16.mxu0 %v418_v60  ;;  %v1145_v58 = vld [vmem:[%s2233_s5 + $0xf8] sm:$0xff]  ;;  %v465_v31 = vunpack.c.h.s8.bf16 %v401_v25 }
  0x59   : > { %910 = vmatprep.mubr.bf16.mxu1 %v420_v61  ;;  %1243 = vperm.xlu1 %1970, %v1133_v28   ;;  %v396_v60 = vld [vmem:[%s2224_s24 + $0xb8] sm:$0xff]  ;;  %v441_v61 = vunpack.c.h.s8.bf16 %v389_v50 }
  0x5a   : > { %v448_v0 = vunpack.c.l.s8.bf16 %v396_v60 }
  0x5b   : > { %1248 = vperm.xlu0 %1969, %v1134_v29   ;;  %v466_v29 = vunpack.c.h.s8.bf16 %v402_v19 }
  0x5d   : > { %1253 = vperm.xlu1 %1970, %v1135_v32  }
  0x5f   : > { %750 = vmatmul.mubr.bf16.gmra.mxu0 %v417_v3  ;;  %1258 = vperm.xlu0 %1969, %v1136_v35   ;;  %v445_v3 = vunpack.c.l.s8.bf16 %v393_v1 }
  0x60   : > { %911 = vmatmul.mubr.bf16.gmra.mxu1 %v419_v4  ;;  %757 = vmatprep.mubr.bf16.mxu0 %v422_v6  ;;  %v447_v4 = vunpack.c.l.s8.bf16 %v395_v2  ;;  %v452_v6 = vunpack.c.h.s8.bf16 %v396_v60 }
  0x61   : > { %918 = vmatprep.mubr.bf16.mxu1 %v424_v7  ;;  %1263 = vperm.xlu1 %1970, %v1137_v38   ;;  %v398_v7 = vld [vmem:[%s2224_s24 + $0xc8] sm:$0xff] }
  0x62   : > { %v454_v11 = vunpack.c.l.s8.bf16 %v398_v7 }
  0x63   : > { %1268 = vperm.xlu0 %1969, %v1138_v39  }
  0x65   : > { %1273 = vperm.xlu1 %1970, %v1139_v42  }
  0x67   : > { %758 = vmatmul.mubr.bf16.gmra.mxu0 %v421_v13  ;;  %1278 = vperm.xlu0 %1969, %v1140_v45   ;;  %v397_v13 = vld [vmem:[%s2224_s24 + $0xc0] sm:$0xff] }
  0x68   : > { %919 = vmatmul.mubr.bf16.gmra.mxu1 %v423_v14  ;;  %765 = vmatprep.mubr.bf16.mxu0 %v426_v16  ;;  %v399_v14 = vld [vmem:[%s2224_s24 + $0xd0] sm:$0xff]  ;;  %v453_v15 = vunpack.c.l.s8.bf16 %v397_v13  ;;  %v457_v21 = vunpack.c.h.s8.bf16 %v397_v13 }
  0x69   : > { %926 = vmatprep.mubr.bf16.mxu1 %v428_v17  ;;  %1283 = vperm.xlu1 %1970, %v1141_v48   ;;  %v455_v16 = vunpack.c.l.s8.bf16 %v399_v14  ;;  %v458_v17 = vunpack.c.h.s8.bf16 %v398_v7  ;;  %v459_v22 = vunpack.c.h.s8.bf16 %v399_v14 }
  0x6b   : > { %1288 = vperm.xlu0 %1969, %v1142_v49  }
  0x6d   : > { %1293 = vperm.xlu1 %1970, %v1143_v52  }
  0x6f   : > { %766 = vmatmul.mubr.bf16.gmra.mxu0 %v425_v23  ;;  %1298 = vperm.xlu0 %1969, %v1144_v55   ;;  %v462_v23 = vunpack.c.l.s8.bf16 %v402_v19 }
  0x70   : > { %927 = vmatmul.mubr.bf16.gmra.mxu1 %v427_v24  ;;  %773 = vmatprep.mubr.bf16.mxu0 %v430_v26  ;;  %v464_v24 = vunpack.c.l.s8.bf16 %v404_v20  ;;  %v403_v26 = vld [vmem:[%s2224_s24 + $0xf0] sm:$0xff]  ;;  %s2115_s24 = smov [#allocation6]  }
  0x71   : > { %934 = vmatprep.mubr.bf16.mxu1 %v432_v27  ;;  %1303 = vperm.xlu1 %1970, %v1145_v58   ;;  %v461_v27 = vunpack.c.l.s8.bf16 %v401_v25  ;;  %v463_v28 = vunpack.c.l.s8.bf16 %v403_v26  ;;  %v467_v32 = vunpack.c.h.s8.bf16 %v403_v26  ;;  %s2033_s26 = sshll.u32 %s2115_s24, 4  ;;  %s2034_s26 = int_to_ptr.vmem [resolvable:$false] %s2033_s26 }
  0x72   : > { %s2035_s29 = scalar_lea.vmem %s2034_s26, 8192  ;;  %p2036_p1 = scmp.lt.s32.totalorder %s2375_s12, %s2034_s26 }
  0x73   : > { %p2037_p2 = scmp.lt.s32.totalorder %s2035_s29, %s2029_s22 }
  0x75   : > { %p2038_p3 = por %p2037_p2, %p2036_p1 }
  0x77   : > { %774 = vmatmul.mubr.bf16.gmra.mxu0 %v429_v33  ;;  %p2039_p5 = pnand %p2038_p3, %p2032_p0 }
  0x78   : > { %935 = vmatmul.mubr.bf16.gmra.mxu1 %v431_v34  ;;  %781 = vmatprep.mubr.bf16.mxu0 %v434_v36 }
  0x79   : > { %942 = vmatprep.mubr.bf16.mxu1 %v436_v37 }
  0x7f   : > { %782 = vmatmul.mubr.bf16.gmra.mxu0 %v433_v43  ;;  %v2299_v43 = vld [vmem:[%s2428_s3] ss:$0 sm:$0xff] }
  0x80   : > { %943 = vmatmul.mubr.bf16.gmra.mxu1 %v435_v44  ;;  %789 = vmatprep.mubr.bf16.mxu0 %v438_v46 }
  0x81   : > { %950 = vmatprep.mubr.bf16.mxu1 %v440_v47 }
  0x87   : > { %790 = vmatmul.mubr.bf16.gmra.mxu0 %v437_v53 }
  0x88   : > { %951 = vmatmul.mubr.bf16.gmra.mxu1 %v439_v54  ;;  %797 = vmatprep.mubr.bf16.mxu0 %v442_v56 }
  0x89   : > { %958 = vmatprep.mubr.bf16.mxu1 %v444_v57 }
  0x8f   : > { %798 = vmatmul.mubr.bf16.gmra.mxu0 %v441_v61 }
  0x90   : > { %959 = vmatmul.mubr.bf16.gmra.mxu1 %v443_v62  ;;  %805 = vmatprep.mubr.bf16.mxu0 %v446_v63 }
  0x91   : > { %966 = vmatprep.mubr.bf16.mxu1 %v448_v0 }
  0x97   : > { %806 = vmatmul.mubr.bf16.gmra.mxu0 %v445_v3 }
  0x98   : > { %967 = vmatmul.mubr.bf16.gmra.mxu1 %v447_v4  ;;  %813 = vmatprep.mubr.bf16.mxu0 %v450_v5 }
  0x99   : > { %974 = vmatprep.mubr.bf16.mxu1 %v452_v6 }
  0x9f   : > { %814 = vmatmul.mubr.bf16.gmra.mxu0 %v449_v9 }
  0xa0   : > { %975 = vmatmul.mubr.bf16.gmra.mxu1 %v451_v10  ;;  %821 = vmatprep.mubr.bf16.mxu0 %v454_v11 }
  0xa1   : > { %982 = vmatprep.mubr.bf16.mxu1 %v456_v12 }
  0xa7   : > { %822 = vmatmul.mubr.bf16.gmra.mxu0 %v453_v15 }
  0xa8   : > { %983 = vmatmul.mubr.bf16.gmra.mxu1 %v455_v16  ;;  %829 = vmatprep.mubr.bf16.mxu0 %v458_v17 }
  0xa9   : > { %990 = vmatprep.mubr.bf16.mxu1 %v460_v18 }
  0xae   : > { %v1149_v35 = vpop.permute.xlu0 %1148  ;;  %v1159_v57 = vpop.permute.xlu1 %1158 }
  0xaf   : > { %830 = vmatmul.mubr.bf16.gmra.mxu0 %v457_v21 }
  0xb0   : > { %991 = vmatmul.mubr.bf16.gmra.mxu1 %v459_v22  ;;  %837 = vmatprep.mubr.bf16.mxu0 %v462_v23 }
  0xb1   : > { %998 = vmatprep.mubr.bf16.mxu1 %v464_v24 }
  0xb2   : > { %v1154_v49 = vpop.permute.xlu0 %1153  ;;  %v1164_v11 = vpop.permute.xlu1 %1163 }
  0xb6   : > { %v1169_v23 = vpop.permute.xlu0 %1168 }
  0xb7   : > { %838 = vmatmul.mubr.bf16.gmra.mxu0 %v461_v27 }
  0xb8   : > { %999 = vmatmul.mubr.bf16.gmra.mxu1 %v463_v28  ;;  %845 = vmatprep.mubr.bf16.mxu0 %v466_v29 }
  0xb9   : > { %1006 = vmatprep.mubr.bf16.mxu1 %v468_v30 }
  0xbf   : > { %846 = vmatmul.mubr.bf16.gmra.mxu0 %v465_v31 }
  0xc0   : > { %1007 = vmatmul.mubr.bf16.gmra.mxu1 %v467_v32 }
 0x107   : > { %v1690_v33 = vpop.f32.mrf.mxu0 }
 0x108   : > { %v1802_v34 = vpop.f32.mrf.mxu1 }
 0x109   : > { %v1691_v36 = vpop.f32.mrf.mxu0 }
 0x10a   : > { %v1803_v37 = vpop.f32.mrf.mxu1  ;;  %v1692_v38 = vadd.f32 %v1691_v36, %v1690_v33 }
 0x10b   : > { %v1804_v39 = vadd.f32 %v1803_v37, %v1802_v34  ;;  %v1693_v40 = vpop.f32.mrf.mxu0 }
 0x10c   : > { %v1805_v41 = vpop.f32.mrf.mxu1 }
 0x10d   : > { %v889_v42 = vadd.f32 %v1804_v39, %v1692_v38  ;;  %v1694_v44 = vpop.f32.mrf.mxu0  ;;  %v1174_v39 = vpop.permute.xlu1 %1173 }
 0x10e   : > { %v1806_v45 = vpop.f32.mrf.mxu1  ;;  %v1695_v47 = vadd.f32 %v1694_v44, %v1693_v40 }
 0x10f   : > { %v1306_v46 = vmul.f32 %v1149_v35, %v889_v42  ;;  %v1807_v48 = vadd.f32 %v1806_v45, %v1805_v41  ;;  %v1696_v50 = vpop.f32.mrf.mxu0 }
 0x110   : > { %v1808_v51 = vpop.f32.mrf.mxu1 }
 0x111   : > { %v1345_v52 = vadd.f32 %v2299_v43, %v1306_v46  ;;  %v892_v53 = vadd.f32 %v1807_v48, %v1695_v47  ;;  %v1697_v54 = vpop.f32.mrf.mxu0  ;;  %v1179_v48 = vpop.permute.xlu0 %1178 }
 0x112   : > { %v1809_v55 = vpop.f32.mrf.mxu1  ;;  %v1698_v59 = vadd.f32 %v1697_v54, %v1696_v50 }
 0x113   : > { %vm1377_vm0 = vcmp.ge.f32.partialorder %v1345_v52, 0.0  ;;  %v1409_v56 = vmul.f32 0.2, %v1345_v52  ;;  %v1307_v58 = vmul.f32 %v1154_v49, %v892_v53  ;;  %v1810_v60 = vadd.f32 %v1809_v55, %v1808_v51  ;;  %v1699_v61 = vpop.f32.mrf.mxu0 }
 0x114   : > { %v1811_v62 = vpop.f32.mrf.mxu1 }
 0x115   : > { %v1441_v63 = vsel %vm1377_vm0, %v1345_v52, %v1409_v56  ;;  %v1346_v0 = vadd.f32 %v2299_v43, %v1307_v58  ;;  %v897_v1 = vadd.f32 %v1810_v60, %v1698_v59  ;;  %v1700_v2 = vpop.f32.mrf.mxu0  ;;  %v1184_v59 = vpop.permute.xlu1 %1183 }
 0x116   : > { %1473 = vst [vmem:[%s2305_s10] sm:$0xff] %v1441_v63  ;;  %v1812_v3 = vpop.f32.mrf.mxu1  ;;  %v1701_v5 = vadd.f32 %v1700_v2, %v1699_v61 }
 0x117   : > { %vm1378_vm1 = vcmp.ge.f32.partialorder %v1346_v0, 0.0  ;;  %v1410_v4 = vmul.f32 0.2, %v1346_v0  ;;  %v1813_v6 = vadd.f32 %v1812_v3, %v1811_v62  ;;  %v1308_v7 = vmul.f32 %v1159_v57, %v897_v1  ;;  %v1702_v8 = vpop.f32.mrf.mxu0 }
 0x118   : > { %v1814_v9 = vpop.f32.mrf.mxu1 }
 0x119   : > { %v1442_v10 = vsel %vm1378_vm1, %v1346_v0, %v1410_v4  ;;  %v900_v12 = vadd.f32 %v1813_v6, %v1701_v5  ;;  %v1347_v13 = vadd.f32 %v2299_v43, %v1308_v7  ;;  %v1703_v14 = vpop.f32.mrf.mxu0 }
 0x11a   : > { %1474 = vst [vmem:[%s2305_s10 + $0x8] sm:$0xff] %v1442_v10  ;;  %v1815_v15 = vpop.f32.mrf.mxu1  ;;  %v1704_v17 = vadd.f32 %v1703_v14, %v1702_v8 }
 0x11b   : > { %v1309_v16 = vmul.f32 %v1164_v11, %v900_v12  ;;  %v1816_v18 = vadd.f32 %v1815_v15, %v1814_v9  ;;  %vm1379_vm2 = vcmp.ge.f32.partialorder %v1347_v13, 0.0  ;;  %v1411_v19 = vmul.f32 0.2, %v1347_v13  ;;  %v1705_v20 = vpop.f32.mrf.mxu0  ;;  %v1189_v12 = vpop.permute.xlu0 %1188 }
 0x11c   : > { %v1817_v21 = vpop.f32.mrf.mxu1 }
 0x11d   : > { %v1348_v22 = vadd.f32 %v2299_v43, %v1309_v16  ;;  %v905_v24 = vadd.f32 %v1816_v18, %v1704_v17  ;;  %v1443_v25 = vsel %vm1379_vm2, %v1347_v13, %v1411_v19  ;;  %v1706_v26 = vpop.f32.mrf.mxu0  ;;  %v1194_v19 = vpop.permute.xlu1 %1193 }
 0x11e   : > { %v1818_v27 = vpop.f32.mrf.mxu1  ;;  %1475 = vst [vmem:[%s2305_s10 + $0x10] sm:$0xff] %v1443_v25  ;;  %v1707_v30 = vadd.f32 %v1706_v26, %v1705_v20 }
 0x11f   : > { %vm1380_vm3 = vcmp.ge.f32.partialorder %v1348_v22, 0.0  ;;  %v1412_v28 = vmul.f32 0.2, %v1348_v22  ;;  %v1310_v29 = vmul.f32 %v1169_v23, %v905_v24  ;;  %v1819_v31 = vadd.f32 %v1818_v27, %v1817_v21  ;;  %v1708_v32 = vpop.f32.mrf.mxu0 }
 0x120   : > { %v1820_v33 = vpop.f32.mrf.mxu1 }
 0x121   : > { %v1444_v34 = vsel %vm1380_vm3, %v1348_v22, %v1412_v28  ;;  %v1349_v35 = vadd.f32 %v2299_v43, %v1310_v29  ;;  %v908_v36 = vadd.f32 %v1819_v31, %v1707_v30  ;;  %v1709_v37 = vpop.f32.mrf.mxu0  ;;  %v1199_v31 = vpop.permute.xlu0 %1198 }
 0x122   : > { %1476 = vst [vmem:[%s2305_s10 + $0x18] sm:$0xff] %v1444_v34  ;;  %v1821_v38 = vpop.f32.mrf.mxu1  ;;  %v1710_v41 = vadd.f32 %v1709_v37, %v1708_v32 }
 0x123   : > { %vm1381_vm4 = vcmp.ge.f32.partialorder %v1349_v35, 0.0  ;;  %v1413_v40 = vmul.f32 0.2, %v1349_v35  ;;  %v1822_v42 = vadd.f32 %v1821_v38, %v1820_v33  ;;  %v1311_v44 = vmul.f32 %v1174_v39, %v908_v36  ;;  %v1711_v45 = vpop.f32.mrf.mxu0 }
 0x124   : > { %v1823_v46 = vpop.f32.mrf.mxu1 }
 0x125   : > { %v1445_v47 = vsel %vm1381_vm4, %v1349_v35, %v1413_v40  ;;  %v913_v49 = vadd.f32 %v1822_v42, %v1710_v41  ;;  %v1350_v50 = vadd.f32 %v2299_v43, %v1311_v44  ;;  %v1712_v51 = vpop.f32.mrf.mxu0 }
 0x126   : > { %1477 = vst [vmem:[%s2305_s10 + $0x20] sm:$0xff] %v1445_v47  ;;  %v1824_v52 = vpop.f32.mrf.mxu1  ;;  %v1713_v54 = vadd.f32 %v1712_v51, %v1711_v45 }
 0x127   : > { %v1312_v53 = vmul.f32 %v1179_v48, %v913_v49  ;;  %v1825_v55 = vadd.f32 %v1824_v52, %v1823_v46  ;;  %vm1382_vm5 = vcmp.ge.f32.partialorder %v1350_v50, 0.0  ;;  %v1414_v56 = vmul.f32 0.2, %v1350_v50  ;;  %v1714_v57 = vpop.f32.mrf.mxu0  ;;  %v1204_v49 = vpop.permute.xlu1 %1203 }
 0x128   : > { %v1826_v58 = vpop.f32.mrf.mxu1 }
 0x129   : > { %v1351_v60 = vadd.f32 %v2299_v43, %v1312_v53  ;;  %v916_v61 = vadd.f32 %v1825_v55, %v1713_v54  ;;  %v1446_v62 = vsel %vm1382_vm5, %v1350_v50, %v1414_v56  ;;  %v1715_v63 = vpop.f32.mrf.mxu0  ;;  %v1209_v56 = vpop.permute.xlu0 %1208 }
 0x12a   : > { %v1827_v0 = vpop.f32.mrf.mxu1  ;;  %1478 = vst [vmem:[%s2305_s10 + $0x28] sm:$0xff] %v1446_v62  ;;  %v1716_v3 = vadd.f32 %v1715_v63, %v1714_v57 }
 0x12b   : > { %vm1383_vm6 = vcmp.ge.f32.partialorder %v1351_v60, 0.0  ;;  %v1415_v1 = vmul.f32 0.2, %v1351_v60  ;;  %v1313_v2 = vmul.f32 %v1184_v59, %v916_v61  ;;  %v1828_v4 = vadd.f32 %v1827_v0, %v1826_v58  ;;  %v1717_v5 = vpop.f32.mrf.mxu0 }
 0x12c   : > { %v1829_v6 = vpop.f32.mrf.mxu1 }
 0x12d   : > { %v1447_v7 = vsel %vm1383_vm6, %v1351_v60, %v1415_v1  ;;  %v1352_v8 = vadd.f32 %v2299_v43, %v1313_v2  ;;  %v921_v9 = vadd.f32 %v1828_v4, %v1716_v3  ;;  %v1718_v10 = vpop.f32.mrf.mxu0  ;;  %v1214_v4 = vpop.permute.xlu1 %1213 }
 0x12e   : > { %1479 = vst [vmem:[%s2305_s10 + $0x30] sm:$0xff] %v1447_v7  ;;  %v1830_v11 = vpop.f32.mrf.mxu1  ;;  %v1719_v14 = vadd.f32 %v1718_v10, %v1717_v5 }
 0x12f   : > { %vm1384_vm7 = vcmp.ge.f32.partialorder %v1352_v8, 0.0  ;;  %v1416_v13 = vmul.f32 0.2, %v1352_v8  ;;  %v1831_v15 = vadd.f32 %v1830_v11, %v1829_v6  ;;  %v1314_v16 = vmul.f32 %v1189_v12, %v921_v9  ;;  %v1720_v17 = vpop.f32.mrf.mxu0 }
 0x130   : > { %v1832_v18 = vpop.f32.mrf.mxu1 }
 0x131   : > { %v1448_v20 = vsel %vm1384_vm7, %v1352_v8, %v1416_v13  ;;  %v924_v21 = vadd.f32 %v1831_v15, %v1719_v14  ;;  %v1353_v22 = vadd.f32 %v2299_v43, %v1314_v16  ;;  %v1721_v23 = vpop.f32.mrf.mxu0 }
 0x132   : > { %1480 = vst [vmem:[%s2305_s10 + $0x38] sm:$0xff] %v1448_v20  ;;  %v1833_v24 = vpop.f32.mrf.mxu1  ;;  %v1722_v26 = vadd.f32 %v1721_v23, %v1720_v17 }
 0x133   : > { %v1315_v25 = vmul.f32 %v1194_v19, %v924_v21  ;;  %v1834_v27 = vadd.f32 %v1833_v24, %v1832_v18  ;;  %vm1385_vm8 = vcmp.ge.f32.partialorder %v1353_v22, 0.0  ;;  %v1417_v28 = vmul.f32 0.2, %v1353_v22  ;;  %v1723_v29 = vpop.f32.mrf.mxu0  ;;  %v1219_v21 = vpop.permute.xlu0 %1218 }
 0x134   : > { %v1835_v30 = vpop.f32.mrf.mxu1 }
 0x135   : > { %v1354_v32 = vadd.f32 %v2299_v43, %v1315_v25  ;;  %v929_v33 = vadd.f32 %v1834_v27, %v1722_v26  ;;  %v1449_v34 = vsel %vm1385_vm8, %v1353_v22, %v1417_v28  ;;  %v1724_v35 = vpop.f32.mrf.mxu0  ;;  %v1224_v28 = vpop.permute.xlu1 %1223 }
 0x136   : > { %v1836_v36 = vpop.f32.mrf.mxu1  ;;  %1481 = vst [vmem:[%s2305_s10 + $0x40] sm:$0xff] %v1449_v34  ;;  %v1725_v39 = vadd.f32 %v1724_v35, %v1723_v29 }
 0x137   : > { %vm1386_vm9 = vcmp.ge.f32.partialorder %v1354_v32, 0.0  ;;  %v1418_v37 = vmul.f32 0.2, %v1354_v32  ;;  %v1316_v38 = vmul.f32 %v1199_v31, %v929_v33  ;;  %v1837_v40 = vadd.f32 %v1836_v36, %v1835_v30  ;;  %v1726_v41 = vpop.f32.mrf.mxu0 }
 0x138   : > { %v1838_v42 = vpop.f32.mrf.mxu1 }
 0x139   : > { %v1450_v44 = vsel %vm1386_vm9, %v1354_v32, %v1418_v37  ;;  %v1355_v45 = vadd.f32 %v2299_v43, %v1316_v38  ;;  %v932_v46 = vadd.f32 %v1837_v40, %v1725_v39  ;;  %v1727_v47 = vpop.f32.mrf.mxu0  ;;  %v1229_v40 = vpop.permute.xlu0 %1228 }
 0x13a   : > { %1482 = vst [vmem:[%s2305_s10 + $0x48] sm:$0xff] %v1450_v44  ;;  %v1839_v48 = vpop.f32.mrf.mxu1  ;;  %v1728_v51 = vadd.f32 %v1727_v47, %v1726_v41 }
 0x13b   : > { %vm1387_vm10 = vcmp.ge.f32.partialorder %v1355_v45, 0.0  ;;  %v1419_v50 = vmul.f32 0.2, %v1355_v45  ;;  %v1840_v52 = vadd.f32 %v1839_v48, %v1838_v42  ;;  %v1317_v53 = vmul.f32 %v1204_v49, %v932_v46  ;;  %v1729_v54 = vpop.f32.mrf.mxu0 }
 0x13c   : > { %v1841_v55 = vpop.f32.mrf.mxu1 }
 0x13d   : > { %v1451_v57 = vsel %vm1387_vm10, %v1355_v45, %v1419_v50  ;;  %v937_v58 = vadd.f32 %v1840_v52, %v1728_v51  ;;  %v1356_v59 = vadd.f32 %v2299_v43, %v1317_v53  ;;  %v1730_v60 = vpop.f32.mrf.mxu0 }
 0x13e   : > { %1483 = vst [vmem:[%s2305_s10 + $0x50] sm:$0xff] %v1451_v57  ;;  %v1842_v61 = vpop.f32.mrf.mxu1  ;;  %v1731_v63 = vadd.f32 %v1730_v60, %v1729_v54 }
 0x13f   : > { %v1318_v62 = vmul.f32 %v1209_v56, %v937_v58  ;;  %v1843_v0 = vadd.f32 %v1842_v61, %v1841_v55  ;;  %vm1388_vm11 = vcmp.ge.f32.partialorder %v1356_v59, 0.0  ;;  %v1420_v1 = vmul.f32 0.2, %v1356_v59  ;;  %v1732_v2 = vpop.f32.mrf.mxu0  ;;  %v1234_v58 = vpop.permute.xlu1 %1233 }
 0x140   : > { %v1844_v3 = vpop.f32.mrf.mxu1 }
 0x141   : > { %v1357_v5 = vadd.f32 %v2299_v43, %v1318_v62  ;;  %v940_v6 = vadd.f32 %v1843_v0, %v1731_v63  ;;  %v1452_v7 = vsel %vm1388_vm11, %v1356_v59, %v1420_v1  ;;  %v1733_v8 = vpop.f32.mrf.mxu0  ;;  %v1239_v1 = vpop.permute.xlu0 %1238 }
 0x142   : > { %v1845_v9 = vpop.f32.mrf.mxu1  ;;  %1484 = vst [vmem:[%s2305_s10 + $0x58] sm:$0xff] %v1452_v7  ;;  %v1734_v12 = vadd.f32 %v1733_v8, %v1732_v2 }
 0x143   : > { %vm1389_vm12 = vcmp.ge.f32.partialorder %v1357_v5, 0.0  ;;  %v1421_v10 = vmul.f32 0.2, %v1357_v5  ;;  %v1319_v11 = vmul.f32 %v1214_v4, %v940_v6  ;;  %v1846_v13 = vadd.f32 %v1845_v9, %v1844_v3  ;;  %v1735_v14 = vpop.f32.mrf.mxu0 }
 0x144   : > { %v1847_v15 = vpop.f32.mrf.mxu1 }
 0x145   : > { %v1453_v16 = vsel %vm1389_vm12, %v1357_v5, %v1421_v10  ;;  %v1358_v17 = vadd.f32 %v2299_v43, %v1319_v11  ;;  %v945_v18 = vadd.f32 %v1846_v13, %v1734_v12  ;;  %v1736_v19 = vpop.f32.mrf.mxu0  ;;  %v1244_v13 = vpop.permute.xlu1 %1243 }
 0x146   : > { %1485 = vst [vmem:[%s2305_s10 + $0x60] sm:$0xff] %v1453_v16  ;;  %v1848_v20 = vpop.f32.mrf.mxu1  ;;  %v1737_v23 = vadd.f32 %v1736_v19, %v1735_v14 }
 0x147   : > { %vm1390_vm13 = vcmp.ge.f32.partialorder %v1358_v17, 0.0  ;;  %v1422_v22 = vmul.f32 0.2, %v1358_v17  ;;  %v1849_v24 = vadd.f32 %v1848_v20, %v1847_v15  ;;  %v1320_v25 = vmul.f32 %v1219_v21, %v945_v18  ;;  %v1738_v26 = vpop.f32.mrf.mxu0 }
 0x148   : > { %v1850_v27 = vpop.f32.mrf.mxu1 }
 0x149   : > { %v1454_v29 = vsel %vm1390_vm13, %v1358_v17, %v1422_v22  ;;  %v948_v30 = vadd.f32 %v1849_v24, %v1737_v23  ;;  %v1359_v31 = vadd.f32 %v2299_v43, %v1320_v25  ;;  %v1739_v32 = vpop.f32.mrf.mxu0 }
 0x14a   : > { %1486 = vst [vmem:[%s2305_s10 + $0x68] sm:$0xff] %v1454_v29  ;;  %v1851_v33 = vpop.f32.mrf.mxu1  ;;  %v1740_v35 = vadd.f32 %v1739_v32, %v1738_v26 }
 0x14b   : > { %v1321_v34 = vmul.f32 %v1224_v28, %v948_v30  ;;  %v1852_v36 = vadd.f32 %v1851_v33, %v1850_v27  ;;  %vm1391_vm14 = vcmp.ge.f32.partialorder %v1359_v31, 0.0  ;;  %v1423_v37 = vmul.f32 0.2, %v1359_v31  ;;  %v1741_v38 = vpop.f32.mrf.mxu0  ;;  %v1249_v30 = vpop.permute.xlu0 %1248 }
 0x14c   : > { %v1853_v39 = vpop.f32.mrf.mxu1 }
 0x14d   : > { %v1360_v41 = vadd.f32 %v2299_v43, %v1321_v34  ;;  %v953_v42 = vadd.f32 %v1852_v36, %v1740_v35  ;;  %v1455_v44 = vsel %vm1391_vm14, %v1359_v31, %v1423_v37  ;;  %v1742_v45 = vpop.f32.mrf.mxu0  ;;  %v1254_v37 = vpop.permute.xlu1 %1253 }
 0x14e   : > { %v1854_v46 = vpop.f32.mrf.mxu1  ;;  %1487 = vst [vmem:[%s2305_s10 + $0x70] sm:$0xff] %v1455_v44  ;;  %v1743_v49 = vadd.f32 %v1742_v45, %v1741_v38 }
 0x14f   : > { %vm1392_vm15 = vcmp.ge.f32.partialorder %v1360_v41, 0.0  ;;  %v1424_v47 = vmul.f32 0.2, %v1360_v41  ;;  %v1322_v48 = vmul.f32 %v1229_v40, %v953_v42  ;;  %v1855_v50 = vadd.f32 %v1854_v46, %v1853_v39  ;;  %v1744_v51 = vpop.f32.mrf.mxu0 }
 0x150   : > { %v1856_v52 = vpop.f32.mrf.mxu1 }
 0x151   : > { %v1456_v53 = vsel %vm1392_vm15, %v1360_v41, %v1424_v47  ;;  %v1361_v54 = vadd.f32 %v2299_v43, %v1322_v48  ;;  %v956_v55 = vadd.f32 %v1855_v50, %v1743_v49  ;;  %v1745_v56 = vpop.f32.mrf.mxu0  ;;  %v1259_v50 = vpop.permute.xlu0 %1258 }
 0x152   : > { %1488 = vst [vmem:[%s2305_s10 + $0x78] sm:$0xff] %v1456_v53  ;;  %v1857_v57 = vpop.f32.mrf.mxu1  ;;  %v1746_v60 = vadd.f32 %v1745_v56, %v1744_v51 }
 0x153   : > { %vm1393_vm0 = vcmp.ge.f32.partialorder %v1361_v54, 0.0  ;;  %v1425_v59 = vmul.f32 0.2, %v1361_v54  ;;  %v1858_v61 = vadd.f32 %v1857_v57, %v1856_v52  ;;  %v1323_v62 = vmul.f32 %v1234_v58, %v956_v55  ;;  %v1747_v63 = vpop.f32.mrf.mxu0 }
 0x154   : > { %v1859_v0 = vpop.f32.mrf.mxu1 }
 0x155   : > { %v1457_v2 = vsel %vm1393_vm0, %v1361_v54, %v1425_v59  ;;  %v961_v3 = vadd.f32 %v1858_v61, %v1746_v60  ;;  %v1362_v4 = vadd.f32 %v2299_v43, %v1323_v62  ;;  %v1748_v5 = vpop.f32.mrf.mxu0 }
 0x156   : > { %1489 = vst [vmem:[%s2305_s10 + $0x80] sm:$0xff] %v1457_v2  ;;  %v1860_v6 = vpop.f32.mrf.mxu1  ;;  %v1749_v8 = vadd.f32 %v1748_v5, %v1747_v63 }
 0x157   : > { %v1324_v7 = vmul.f32 %v1239_v1, %v961_v3  ;;  %v1861_v9 = vadd.f32 %v1860_v6, %v1859_v0  ;;  %vm1394_vm1 = vcmp.ge.f32.partialorder %v1362_v4, 0.0  ;;  %v1426_v10 = vmul.f32 0.2, %v1362_v4  ;;  %v1750_v11 = vpop.f32.mrf.mxu0  ;;  %v1264_v3 = vpop.permute.xlu1 %1263 }
 0x158   : > { %v1862_v12 = vpop.f32.mrf.mxu1 }
 0x159   : > { %v1363_v14 = vadd.f32 %v2299_v43, %v1324_v7  ;;  %v964_v15 = vadd.f32 %v1861_v9, %v1749_v8  ;;  %v1458_v16 = vsel %vm1394_vm1, %v1362_v4, %v1426_v10  ;;  %v1751_v17 = vpop.f32.mrf.mxu0  ;;  %v1269_v10 = vpop.permute.xlu0 %1268 }
 0x15a   : > { %v1863_v18 = vpop.f32.mrf.mxu1  ;;  %1490 = vst [vmem:[%s2305_s10 + $0x88] sm:$0xff] %v1458_v16  ;;  %v1752_v21 = vadd.f32 %v1751_v17, %v1750_v11 }
 0x15b   : > { %vm1395_vm2 = vcmp.ge.f32.partialorder %v1363_v14, 0.0  ;;  %v1427_v19 = vmul.f32 0.2, %v1363_v14  ;;  %v1325_v20 = vmul.f32 %v1244_v13, %v964_v15  ;;  %v1864_v22 = vadd.f32 %v1863_v18, %v1862_v12  ;;  %v1753_v23 = vpop.f32.mrf.mxu0 }
 0x15c   : > { %v1865_v24 = vpop.f32.mrf.mxu1 }
 0x15d   : > { %v1459_v25 = vsel %vm1395_vm2, %v1363_v14, %v1427_v19  ;;  %v1364_v26 = vadd.f32 %v2299_v43, %v1325_v20  ;;  %v969_v27 = vadd.f32 %v1864_v22, %v1752_v21  ;;  %v1754_v28 = vpop.f32.mrf.mxu0  ;;  %v1274_v22 = vpop.permute.xlu1 %1273 }
 0x15e   : > { %1491 = vst [vmem:[%s2305_s10 + $0x90] sm:$0xff] %v1459_v25  ;;  %v1866_v29 = vpop.f32.mrf.mxu1  ;;  %v1755_v32 = vadd.f32 %v1754_v28, %v1753_v23 }
 0x15f   : > { %vm1396_vm3 = vcmp.ge.f32.partialorder %v1364_v26, 0.0  ;;  %v1428_v31 = vmul.f32 0.2, %v1364_v26  ;;  %v1867_v33 = vadd.f32 %v1866_v29, %v1865_v24  ;;  %v1326_v34 = vmul.f32 %v1249_v30, %v969_v27  ;;  %v1756_v35 = vpop.f32.mrf.mxu0 }
 0x160   : > { %v1868_v36 = vpop.f32.mrf.mxu1 }
 0x161   : > { %v1460_v38 = vsel %vm1396_vm3, %v1364_v26, %v1428_v31  ;;  %v972_v39 = vadd.f32 %v1867_v33, %v1755_v32  ;;  %v1365_v40 = vadd.f32 %v2299_v43, %v1326_v34  ;;  %v1757_v41 = vpop.f32.mrf.mxu0 }
 0x162   : > { %1492 = vst [vmem:[%s2305_s10 + $0x98] sm:$0xff] %v1460_v38  ;;  %v1869_v42 = vpop.f32.mrf.mxu1  ;;  %v1758_v45 = vadd.f32 %v1757_v41, %v1756_v35 }
 0x163   : > { %v1327_v44 = vmul.f32 %v1254_v37, %v972_v39  ;;  %v1870_v46 = vadd.f32 %v1869_v42, %v1868_v36  ;;  %vm1397_vm4 = vcmp.ge.f32.partialorder %v1365_v40, 0.0  ;;  %v1429_v47 = vmul.f32 0.2, %v1365_v40  ;;  %v1759_v48 = vpop.f32.mrf.mxu0  ;;  %v1279_v39 = vpop.permute.xlu0 %1278 }
 0x164   : > { %v1871_v49 = vpop.f32.mrf.mxu1 }
 0x165   : > { %v1366_v51 = vadd.f32 %v2299_v43, %v1327_v44  ;;  %v977_v52 = vadd.f32 %v1870_v46, %v1758_v45  ;;  %v1461_v53 = vsel %vm1397_vm4, %v1365_v40, %v1429_v47  ;;  %v1760_v54 = vpop.f32.mrf.mxu0  ;;  %v1284_v47 = vpop.permute.xlu1 %1283 }
 0x166   : > { %v1872_v55 = vpop.f32.mrf.mxu1  ;;  %1493 = vst [vmem:[%s2305_s10 + $0xa0] sm:$0xff] %v1461_v53  ;;  %v1761_v58 = vadd.f32 %v1760_v54, %v1759_v48 }
 0x167   : > { %vm1398_vm5 = vcmp.ge.f32.partialorder %v1366_v51, 0.0  ;;  %v1430_v56 = vmul.f32 0.2, %v1366_v51  ;;  %v1328_v57 = vmul.f32 %v1259_v50, %v977_v52  ;;  %v1873_v59 = vadd.f32 %v1872_v55, %v1871_v49  ;;  %v1762_v60 = vpop.f32.mrf.mxu0 }
 0x168   : > { %v1874_v61 = vpop.f32.mrf.mxu1 }
 0x169   : > { %v1462_v62 = vsel %vm1398_vm5, %v1366_v51, %v1430_v56  ;;  %v1367_v63 = vadd.f32 %v2299_v43, %v1328_v57  ;;  %v980_v0 = vadd.f32 %v1873_v59, %v1761_v58  ;;  %v1763_v1 = vpop.f32.mrf.mxu0  ;;  %v1289_v59 = vpop.permute.xlu0 %1288 }
 0x16a   : > { %1494 = vst [vmem:[%s2305_s10 + $0xa8] sm:$0xff] %v1462_v62  ;;  %v1875_v2 = vpop.f32.mrf.mxu1  ;;  %v1764_v5 = vadd.f32 %v1763_v1, %v1762_v60 }
 0x16b   : > { %vm1399_vm6 = vcmp.ge.f32.partialorder %v1367_v63, 0.0  ;;  %v1431_v4 = vmul.f32 0.2, %v1367_v63  ;;  %v1876_v6 = vadd.f32 %v1875_v2, %v1874_v61  ;;  %v1329_v7 = vmul.f32 %v1264_v3, %v980_v0  ;;  %v1765_v8 = vpop.f32.mrf.mxu0 }
 0x16c   : > { %v1877_v9 = vpop.f32.mrf.mxu1 }
 0x16d   : > { %v1463_v11 = vsel %vm1399_vm6, %v1367_v63, %v1431_v4  ;;  %v985_v12 = vadd.f32 %v1876_v6, %v1764_v5  ;;  %v1368_v13 = vadd.f32 %v2299_v43, %v1329_v7  ;;  %v1766_v14 = vpop.f32.mrf.mxu0 }
 0x16e   : > { %1495 = vst [vmem:[%s2305_s10 + $0xb0] sm:$0xff] %v1463_v11  ;;  %v1878_v15 = vpop.f32.mrf.mxu1  ;;  %v1767_v17 = vadd.f32 %v1766_v14, %v1765_v8 }
 0x16f   : > { %v1330_v16 = vmul.f32 %v1269_v10, %v985_v12  ;;  %v1879_v18 = vadd.f32 %v1878_v15, %v1877_v9  ;;  %vm1400_vm7 = vcmp.ge.f32.partialorder %v1368_v13, 0.0  ;;  %v1432_v19 = vmul.f32 0.2, %v1368_v13  ;;  %v1768_v20 = vpop.f32.mrf.mxu0  ;;  %v1294_v12 = vpop.permute.xlu1 %1293 }
 0x170   : > { %v1880_v21 = vpop.f32.mrf.mxu1 }
 0x171   : > { %v1369_v23 = vadd.f32 %v2299_v43, %v1330_v16  ;;  %v988_v24 = vadd.f32 %v1879_v18, %v1767_v17  ;;  %v1464_v25 = vsel %vm1400_vm7, %v1368_v13, %v1432_v19  ;;  %v1769_v26 = vpop.f32.mrf.mxu0  ;;  %v1299_v19 = vpop.permute.xlu0 %1298 }
 0x172   : > { %v1881_v27 = vpop.f32.mrf.mxu1  ;;  %1496 = vst [vmem:[%s2305_s10 + $0xb8] sm:$0xff] %v1464_v25  ;;  %v1770_v30 = vadd.f32 %v1769_v26, %v1768_v20 }
 0x173   : > { %vm1401_vm8 = vcmp.ge.f32.partialorder %v1369_v23, 0.0  ;;  %v1433_v28 = vmul.f32 0.2, %v1369_v23  ;;  %v1331_v29 = vmul.f32 %v1274_v22, %v988_v24  ;;  %v1882_v31 = vadd.f32 %v1881_v27, %v1880_v21  ;;  %v1771_v32 = vpop.f32.mrf.mxu0 }
 0x174   : > { %v1883_v33 = vpop.f32.mrf.mxu1 }
 0x175   : > { %v1465_v34 = vsel %vm1401_vm8, %v1369_v23, %v1433_v28  ;;  %v1370_v35 = vadd.f32 %v2299_v43, %v1331_v29  ;;  %v993_v36 = vadd.f32 %v1882_v31, %v1770_v30  ;;  %v1772_v37 = vpop.f32.mrf.mxu0  ;;  %v1304_v31 = vpop.permute.xlu1 %1303 }
 0x176   : > { %1497 = vst [vmem:[%s2305_s10 + $0xc0] sm:$0xff] %v1465_v34  ;;  %v1884_v38 = vpop.f32.mrf.mxu1  ;;  %v1773_v41 = vadd.f32 %v1772_v37, %v1771_v32 }
 0x177   : > { %vm1402_vm9 = vcmp.ge.f32.partialorder %v1370_v35, 0.0  ;;  %v1434_v40 = vmul.f32 0.2, %v1370_v35  ;;  %v1885_v42 = vadd.f32 %v1884_v38, %v1883_v33  ;;  %v1332_v44 = vmul.f32 %v1279_v39, %v993_v36  ;;  %v1774_v45 = vpop.f32.mrf.mxu0 }
 0x178   : > { %v1886_v46 = vpop.f32.mrf.mxu1 }
 0x179   : > { %v1466_v48 = vsel %vm1402_vm9, %v1370_v35, %v1434_v40  ;;  %v996_v49 = vadd.f32 %v1885_v42, %v1773_v41  ;;  %v1371_v50 = vadd.f32 %v2299_v43, %v1332_v44  ;;  %v1775_v51 = vpop.f32.mrf.mxu0 }
 0x17a   : > { %1498 = vst [vmem:[%s2305_s10 + $0xc8] sm:$0xff] %v1466_v48  ;;  %v1887_v52 = vpop.f32.mrf.mxu1  ;;  %v1776_v54 = vadd.f32 %v1775_v51, %v1774_v45 }
 0x17b   : > { %v1333_v53 = vmul.f32 %v1284_v47, %v996_v49  ;;  %v1888_v55 = vadd.f32 %v1887_v52, %v1886_v46  ;;  %vm1403_vm10 = vcmp.ge.f32.partialorder %v1371_v50, 0.0  ;;  %v1435_v56 = vmul.f32 0.2, %v1371_v50  ;;  %v1777_v57 = vpop.f32.mrf.mxu0 }
 0x17c   : > { %v1889_v58 = vpop.f32.mrf.mxu1 }
 0x17d   : > { %v1372_v60 = vadd.f32 %v2299_v43, %v1333_v53  ;;  %v1001_v61 = vadd.f32 %v1888_v55, %v1776_v54  ;;  %v1467_v62 = vsel %vm1403_vm10, %v1371_v50, %v1435_v56  ;;  %v1778_v63 = vpop.f32.mrf.mxu0 }
 0x17e   : > { %v1890_v0 = vpop.f32.mrf.mxu1  ;;  %1499 = vst [vmem:[%s2305_s10 + $0xd0] sm:$0xff] %v1467_v62  ;;  %v1779_v3 = vadd.f32 %v1778_v63, %v1777_v57 }
 0x17f   : > { %vm1404_vm11 = vcmp.ge.f32.partialorder %v1372_v60, 0.0  ;;  %v1436_v1 = vmul.f32 0.2, %v1372_v60  ;;  %v1334_v2 = vmul.f32 %v1289_v59, %v1001_v61  ;;  %v1891_v4 = vadd.f32 %v1890_v0, %v1889_v58  ;;  %v1780_v5 = vpop.f32.mrf.mxu0 }
 0x180   : > { %v1892_v6 = vpop.f32.mrf.mxu1 }
 0x181   : > { %v1468_v7 = vsel %vm1404_vm11, %v1372_v60, %v1436_v1  ;;  %v1373_v8 = vadd.f32 %v2299_v43, %v1334_v2  ;;  %v1004_v9 = vadd.f32 %v1891_v4, %v1779_v3  ;;  %v1781_v10 = vpop.f32.mrf.mxu0 }
 0x182   : > { %1500 = vst [vmem:[%s2305_s10 + $0xd8] sm:$0xff] %v1468_v7  ;;  %v1893_v11 = vpop.f32.mrf.mxu1  ;;  %v1782_v14 = vadd.f32 %v1781_v10, %v1780_v5 }
 0x183   : > { %vm1405_vm12 = vcmp.ge.f32.partialorder %v1373_v8, 0.0  ;;  %v1437_v13 = vmul.f32 0.2, %v1373_v8  ;;  %v1894_v15 = vadd.f32 %v1893_v11, %v1892_v6  ;;  %v1335_v16 = vmul.f32 %v1294_v12, %v1004_v9  ;;  %v1783_v17 = vpop.f32.mrf.mxu0 }
 0x184   : > { %v1895_v18 = vpop.f32.mrf.mxu1 }
 0x185   : > { %v1469_v20 = vsel %vm1405_vm12, %v1373_v8, %v1437_v13  ;;  %v1009_v21 = vadd.f32 %v1894_v15, %v1782_v14  ;;  %v1374_v22 = vadd.f32 %v2299_v43, %v1335_v16  ;;  %v1784_v23 = vpop.f32.mrf.mxu0 }
 0x186   : > { %1501 = vst [vmem:[%s2305_s10 + $0xe0] sm:$0xff] %v1469_v20  ;;  %v1896_v24 = vpop.f32.mrf.mxu1  ;;  %v1785_v26 = vadd.f32 %v1784_v23, %v1783_v17 }
 0x187   : > { %v1336_v25 = vmul.f32 %v1299_v19, %v1009_v21  ;;  %v1897_v27 = vadd.f32 %v1896_v24, %v1895_v18  ;;  %vm1406_vm13 = vcmp.ge.f32.partialorder %v1374_v22, 0.0  ;;  %v1438_v28 = vmul.f32 0.2, %v1374_v22 }
 0x189   : > { %v1375_v29 = vadd.f32 %v2299_v43, %v1336_v25  ;;  %v1012_v30 = vadd.f32 %v1897_v27, %v1785_v26  ;;  %v1470_v32 = vsel %vm1406_vm13, %v1374_v22, %v1438_v28 }
 0x18a   : > { %1502 = vst [vmem:[%s2305_s10 + $0xe8] sm:$0xff] %v1470_v32 }
 0x18b   : > { %vm1407_vm14 = vcmp.ge.f32.partialorder %v1375_v29, 0.0  ;;  %v1439_v33 = vmul.f32 0.2, %v1375_v29  ;;  %v1337_v34 = vmul.f32 %v1304_v31, %v1012_v30 }
 0x18d   : > { %v1471_v35 = vsel %vm1407_vm14, %v1375_v29, %v1439_v33  ;;  %v1376_v36 = vadd.f32 %v2299_v43, %v1337_v34 }
 0x18e   : > { %1503 = vst [vmem:[%s2305_s10 + $0xf0] sm:$0xff] %v1471_v35 }
 0x18f   : > { %vm1408_vm15 = vcmp.ge.f32.partialorder %v1376_v36, 0.0  ;;  %v1440_v37 = vmul.f32 0.2, %v1376_v36 }
 0x191   : > { %v1472_v38 = vsel %vm1408_vm15, %v1376_v36, %v1440_v37 }
 0x192   : > { %1504 = vst [vmem:[%s2305_s10 + $0xf8] sm:$0xff] %v1472_v38 }
 0x193   : > { %2042 = shalt.err (!%p2039_p5)
}
 0x194   : > { %s2043_s30 = scalar_lea.hbm %s2373_s21, 4096  ;;  %s2047_s7 = scalar_lea.hbm %s2429_s4, 8192 }
 0x195   : > { %p2044_p6 = scmp.ne.s32.totalorder %s2373_s21, %s2043_s30  ;;  %p2048_p10 = scmp.lt.s32.totalorder %s2373_s21, %s2429_s4 }
 0x196   : > { %p2049_p11 = scmp.lt.s32.totalorder %s2047_s7, %s2043_s30 }
 0x197   : > { %p2045_p7 = pnand %p2044_p6, %p2183_p4 }
 0x198   : > { %p2050_p12 = por %p2049_p11, %p2048_p10 }
 0x199   : > { %p2046_p9 = pneg %p2045_p7 }
 0x19b   : > { %p2051_p13 = pnand %p2050_p12, %p2046_p9 }
 0x19d   : > { %2054 = shalt.err (!%p2051_p13)
}
 0x19e   : > { %s2116_s10 = smov 128   ;;  %s2117_s11 = smov 8  }
 0x19f   : > { %1902 = dma.vmem_to_hbm [thread:$0]  (%p2183_p4), %s2375_s12, 4096, %s2373_s21, %s2380_s18, %s2116_s10, %s2116_s10, %s2117_s11  }
 0x1a0 PF: > { %p1914_p0 = scmp.ge.s32.totalorder %s2109_s20, 2  ;;  %s1534_s13 = sand.u32 1, %s2089_s15  }
 0x1a1   : > { %s1535_s14 = scalar_lea.sflag [#allocation5], %s1534_s13 }
 0x1a2   : > { %p1909_p1 = pnand %p1914_p0, %p2190_p8 }
 0x1a4   : > { %p1910_p2 = pneg %p1909_p1 }
 0x1a6   : > { %2084 = dma.done.wait (%p1910_p2), %s1535_s14, 4096  }
 0x1a7   : > { %2086 = vsyncadd (%p1910_p2), %s1535_s14, 4294963200  ;;  %s18_s20 = sadd.s32 1, %s2109_s20   ;;  %s2434_s15 = smov %s2093_s16 }
 0x1a8   : > { %p15_p3 = scmp.ge.s32.totalorder %s18_s20, 4   ;;  %s2435_s16 = smov %s2097_s17 }
 0x1a9   : > { %s2436_s17 = smov %s2196_s28  ;;  %s2437_s18 = smov %s2105_s19 }
 0x1aa   : > { %s2438_s19 = smov %s2440_s23  ;;  %17 = sbr.rel (!%p15_p3) target bundleno = 5 (0x5), region = 88 }
 0x1af   :  { %1540 = vsyncpa [#allocation4], 1 }
 0x1b0   :  { %1542 = vsyncpa [#allocation4 + $0x1], 1 }
 0x1b1   :  { %1543 = vsyncpa [#allocation5], 1 }
 0x1b2   :  { %1545 = vsyncpa [#allocation5 + $0x1], 1 }

</bundles_post_ra>
